<compile_context>
chip_gen: v6e
topology: v6e:2x2x1
jax: 0.10.0
libtpu: 0.0.40
codegen_flags: <defaults>
</compile_context>

<pallas_src>
import functools

import jax
import jax.numpy as jnp
from jax.experimental import pallas as pl
from jax.experimental.pallas import tpu as pltpu


def _encoder_kernel(w_ref, p_ref, b_ref, o_ref):
    """Fused (scaled-weight) GEMM + bias + ReLU for one (image, M-tile) block.

    w_ref: (Cout, Kdim)   bn-scale-folded weights (resident across the grid)
    p_ref: (1, Kdim, t)   im2col patch columns for this image/tile (lane-dense)
    b_ref: (Cout, 1)      folded conv-bias + BN bias (f32, resident)
    o_ref: (1, Cout, t)   lane-dense output tile
    """
    acc = jnp.dot(w_ref[...], p_ref[0], preferred_element_type=jnp.float32)
    y = acc + b_ref[...]                        # (Cout, 1) broadcasts over lanes
    o_ref[0] = jnp.maximum(y, 0.0).astype(o_ref.dtype)


def _rup(a, m):
    return ((a + m - 1) // m) * m


def encoder_block_forward(
    x_nchw,          # (N, Cin, H, W) float32
    conv_weight,     # (Cout, Cin, KH, KW)  -- PyTorch layout
    conv_bias,       # (Cout,)
    bn_gamma,        # (Cout,)
    bn_beta,         # (Cout,)
    bn_running_mean, # (Cout,)
    bn_running_var,  # (Cout,)
    *,
    stride: int,
    eps: float = 1e-3,           # matches nn.BatchNorm2d(eps=0.001)
    tm: int = 8192,              # lane tile over Mi = OH*OW per image; sweep 4096-16384
    compute_dtype=jnp.bfloat16,  # GEMM operand dtype (accumulation/epilogue in f32)
    out_dtype=jnp.float32,       # set to bf16 if the consumer tolerates it (halves stores)
):
    N, Cin, H, W = x_nchw.shape
    Cout, _, KH, KW = conv_weight.shape
    s = stride

    # ---- TF-style "same" padding (asymmetric), plain-JAX glue ----
    OH = -(-H // s)
    OW = -(-W // s)
    pad_h = max((OH - 1) * s + KH - H, 0)
    pad_w = max((OW - 1) * s + KW - W, 0)
    ph0, ph1 = pad_h // 2, pad_h - pad_h // 2
    pw0, pw1 = pad_w // 2, pad_w - pad_w // 2

    # Cast BEFORE pad/slice so the XLA im2col fusion reads bf16, not f32.
    x = x_nchw.astype(compute_dtype)
    x = jnp.pad(x, ((0, 0), (0, 0), (ph0, ph1), (pw0, pw1)))

    cols = []
    for kh in range(KH):
        for kw in range(KW):
            cols.append(x[:, :, kh:kh + (OH - 1) * s + 1:s,
                          kw:kw + (OW - 1) * s + 1:s])        # (N, Cin, OH, OW)
    Kdim = KH * KW * Cin
    Mi = OH * OW
    # (N, KH*KW, Cin, OH, OW) -> (N, Kdim, Mi); k ordered (kh, kw, ci), m ordered (oh, ow)
    patches = jnp.stack(cols, axis=1).reshape(N, Kdim, Mi)

    # ---- fold conv bias + BN(eval) into per-channel scale/bias; fold scale into W ----
    scale = bn_gamma / jnp.sqrt(bn_running_var + eps)                     # (Cout,)
    bias = bn_beta + scale * (conv_bias - bn_running_mean)                # (Cout,)
    w_mat = jnp.transpose(conv_weight, (0, 2, 3, 1)).reshape(Cout, Kdim)  # (kh,kw,ci) cols
    w_mat = (w_mat * scale[:, None]).astype(compute_dtype)
    bias2d = bias.reshape(Cout, 1).astype(jnp.float32)

    # ---- tile selection: lane-dense over Mi, VMEM-aware ----
    itemsize = jnp.dtype(compute_dtype).itemsize
    out_itemsize = jnp.dtype(out_dtype).itemsize
    row_mult = (8 * 4) // itemsize                   # sublane packing: 8 (f32) / 16 (bf16)
    kdim_pad = _rup(Kdim, row_mult)
    cout_pad = _rup(Cout, 8)
    per_col = (2 * kdim_pad * itemsize               # double-buffered patch tile
               + 2 * cout_pad * out_itemsize         # double-buffered output tile
               + 2 * cout_pad * 4)                   # f32 accumulator + epilogue temps
    vmem_budget = 24 * 1024 * 1024                   # conservative for v7x (64 MiB physical)
    max_cols = max(128, ((vmem_budget // per_col) // 128) * 128)

    t = _rup(max(128, int(tm)), 128)
    t = min(t, max_cols)
    if t >= Mi:
        t = Mi                                       # block == full array dim -> always legal
    num_t = pl.cdiv(Mi, t)

    # v7x megacore: prefer an even total grid so the 2-TensorCore split is balanced.
    if (N * num_t) % 2 == 1 and N * num_t > 1 and Mi > 128:
        t_alt = max(128, _rup(-(-Mi // (num_t + 1)), 128))
        if t_alt < t and (N * pl.cdiv(Mi, t_alt)) % 2 == 0:
            t = t_alt
            num_t = pl.cdiv(Mi, t)

    grid = (N, num_t)                                # ragged last M-tile handled by Pallas

    out = pl.pallas_call(
        _encoder_kernel,
        out_shape=jax.ShapeDtypeStruct((N, Cout, Mi), out_dtype),
        grid_spec=pltpu.PrefetchScalarGridSpec(
            num_scalar_prefetch=0,
            grid=grid,
            in_specs=[
                pl.BlockSpec((Cout, Kdim), lambda n, i: (0, 0)),   # scaled weights (resident)
                pl.BlockSpec((1, Kdim, t), lambda n, i: (n, 0, i)),  # patch columns (lane-dense)
                pl.BlockSpec((Cout, 1), lambda n, i: (0, 0)),      # folded bias (resident)
            ],
            out_specs=pl.BlockSpec((1, Cout, t), lambda n, i: (n, 0, i)),
        ),
        compiler_params=pltpu.CompilerParams(
            dimension_semantics=("parallel", "parallel"),
            vmem_limit_bytes=32 * 1024 * 1024),
    )(w_mat, patches, bias2d)

    # Free reshape (no transpose): (N, Cout, Mi) -> (N, Cout, OH, OW)  == NCHW
    return out.reshape(N, Cout, OH, OW)


def _reference_forward(x_nchw, w, b, gamma, beta, rmean, rvar, *, stride, eps=1e-3):
    """Pure-JAX reference (lax conv) for a sanity check."""
    N, Cin, H, W = x_nchw.shape
    Cout, _, KH, KW = w.shape
    s = stride
    OH = -(-H // s)
    OW = -(-W // s)
    pad_h = max((OH - 1) * s + KH - H, 0)
    pad_w = max((OW - 1) * s + KW - W, 0)
    pads = ((pad_h // 2, pad_h - pad_h // 2), (pad_w // 2, pad_w - pad_w // 2))
    y = jax.lax.conv_general_dilated(
        x_nchw, w, window_strides=(s, s), padding=pads,
        dimension_numbers=("NCHW", "OIHW", "NCHW"))
    y = y + b.reshape(1, Cout, 1, 1)
    y = (y - rmean.reshape(1, Cout, 1, 1)) / jnp.sqrt(rvar.reshape(1, Cout, 1, 1) + eps)
    y = y * gamma.reshape(1, Cout, 1, 1) + beta.reshape(1, Cout, 1, 1)
    return jnp.maximum(y, 0.0)


if __name__ == "__main__":
    # EncoderBlock(in_filters=4, out_filters=8, kernel_size=3, stride=2)
    Cout, K, stride = 8, 3, 2
    key = jax.random.PRNGKey(0)
    k_x, k_w, k_b, k_g, k_be, k_m, k_v, k_x2 = jax.random.split(key, 8)

    # Shared parameters (non-trivial BN stats so the affine fold is actually checked).
    Cin = 4
    conv_w = 0.1 * jax.random.normal(k_w, (Cout, Cin, K, K), dtype=jnp.float32)
    conv_b = 0.1 * jax.random.normal(k_b, (Cout,), dtype=jnp.float32)
    gamma = 0.5 + jax.random.uniform(k_g, (Cout,), dtype=jnp.float32)
    beta = 0.1 * jax.random.normal(k_be, (Cout,), dtype=jnp.float32)
    rmean = 0.1 * jax.random.normal(k_m, (Cout,), dtype=jnp.float32)
    rvar = 0.5 + jax.random.uniform(k_v, (Cout,), dtype=jnp.float32)

    # --- case 1: (2, 4, 16, 16) -> (2, 8, 8, 8); Mi = 64 (single full-width block) ---
    N, H, W = 2, 16, 16
    x = jax.random.normal(k_x, (N, Cin, H, W), dtype=jnp.float32)
    ref = _reference_forward(x, conv_w, conv_b, gamma, beta, rmean, rvar,
                             stride=stride, eps=1e-3)

    fwd_bf16 = jax.jit(functools.partial(
        encoder_block_forward, stride=stride, eps=1e-3, compute_dtype=jnp.bfloat16))
    out = jax.block_until_ready(fwd_bf16(x, conv_w, conv_b, gamma, beta, rmean, rvar))
    assert out.shape == (N, Cout, 8, 8), out.shape
    assert jnp.allclose(out, ref, atol=2e-2, rtol=2e-2), "bf16 path mismatch vs reference"

    # Exactness check of the fused kernel math in f32.
    fwd_f32 = jax.jit(functools.partial(
        encoder_block_forward, stride=stride, eps=1e-3, compute_dtype=jnp.float32))
    out32 = jax.block_until_ready(fwd_f32(x, conv_w, conv_b, gamma, beta, rmean, rvar))
    assert jnp.allclose(out32, ref, atol=1e-4, rtol=1e-4), "f32 path mismatch vs reference"

    # --- case 2: ragged last M-tile. Mi = 18*18 = 324, forced t = 128 -> grid (2, 3),
    #     last tile has only 68 valid columns (garbage lanes must be clipped on store). ---
    N2, H2, W2 = 2, 36, 36
    x2 = jax.random.normal(k_x2, (N2, Cin, H2, W2), dtype=jnp.float32)
    ref2 = _reference_forward(x2, conv_w, conv_b, gamma, beta, rmean, rvar,
                              stride=stride, eps=1e-3)
    fwd_ragged = jax.jit(functools.partial(
        encoder_block_forward, stride=stride, eps=1e-3, tm=128,
        compute_dtype=jnp.bfloat16))
    out2 = jax.block_until_ready(fwd_ragged(x2, conv_w, conv_b, gamma, beta, rmean, rvar))
    assert out2.shape == (N2, Cout, 18, 18), out2.shape
    assert jnp.allclose(out2, ref2, atol=2e-2, rtol=2e-2), "ragged-tile path mismatch"

    print("KERNEL_OK")
</pallas_src>

<mosaic_0001>
module attributes {stable_mosaic.version = 11 : i64} {
  func.func @_encoder_kernel(%arg0: i32, %arg1: i32, %arg2: memref<8x36xbf16, #tpu.memory_space<vmem>>, %arg3: memref<1x36x64xbf16, #tpu.memory_space<vmem>>, %arg4: memref<8x1xf32, #tpu.memory_space<vmem>>, %arg5: memref<1x8x64xf32, #tpu.memory_space<vmem>>) attributes {dimension_semantics = [#tpu.dimension_semantics<parallel>, #tpu.dimension_semantics<parallel>], iteration_bounds = array<i64: 2, 1>, scalar_prefetch = 0 : i64, scratch_operands = 0 : i64, tpu.core_type = #tpu.core_type<tc>, window_params = [{pipeline_mode = #tpu.pipeline_mode<synchronous>, transform_indices = @transform_0, window_bounds = array<i64: 8, 36>}, {transform_indices = @transform_1, window_bounds = array<i64: 1, 36, 64>}, {pipeline_mode = #tpu.pipeline_mode<synchronous>, transform_indices = @transform_2, window_bounds = array<i64: 8, 1>}, {transform_indices = @transform_3, window_bounds = array<i64: 1, 8, 64>}]} {
    %c0 = arith.constant 0 : index
    %c0_0 = arith.constant 0 : index
    %0 = vector.load %arg2[%c0, %c0_0] : memref<8x36xbf16, #tpu.memory_space<vmem>>, vector<8x36xbf16>
    %c0_1 = arith.constant 0 : index
    %c0_2 = arith.constant 0 : index
    %c0_3 = arith.constant 0 : index
    %1 = vector.load %arg3[%c0_1, %c0_2, %c0_3] : memref<1x36x64xbf16, #tpu.memory_space<vmem>>, vector<1x36x64xbf16>
    %2 = vector.shape_cast %1 : vector<1x36x64xbf16> to vector<36x64xbf16>
    %cst = arith.constant dense<0.000000e+00> : vector<8x64xf32>
    %3 = tpu.matmul %0, %2, %cst {dimension_numbers = #tpu.dot_dimension_numbers<[1], [0], [0], [1], [0, 0, 1, 1], [], []>} : vector<8x36xbf16>, vector<36x64xbf16>, vector<8x64xf32> -> vector<8x64xf32>
    %c0_4 = arith.constant 0 : index
    %c0_5 = arith.constant 0 : index
    %4 = vector.load %arg4[%c0_4, %c0_5] : memref<8x1xf32, #tpu.memory_space<vmem>>, vector<8x1xf32>
    %5 = vector.broadcast %4 : vector<8x1xf32> to vector<8x64xf32>
    %6 = arith.addf %3, %5 : vector<8x64xf32>
    %cst_6 = arith.constant 0.000000e+00 : f32
    %7 = vector.broadcast %cst_6 : f32 to vector<8x64xf32>
    %8 = arith.maximumf %6, %7 : vector<8x64xf32>
    %c0_7 = arith.constant 0 : index
    %c0_8 = arith.constant 0 : index
    %c0_9 = arith.constant 0 : index
    %9 = vector.load %arg5[%c0_7, %c0_8, %c0_9] : memref<1x8x64xf32, #tpu.memory_space<vmem>>, vector<1x8x64xf32>
    %10 = vector.shape_cast %9 : vector<1x8x64xf32> to vector<8x64xf32>
    %11 = vector.shape_cast %8 : vector<8x64xf32> to vector<1x8x64xf32>
    tpu.vector_store %arg5[%c0_7, %c0_8, %c0_9], %11 {strides = array<i32>} : memref<1x8x64xf32, #tpu.memory_space<vmem>>, vector<1x8x64xf32>,
    return
  }
  func.func @transform_0(%arg0: i32, %arg1: i32) -> (i32, i32) {
    %c0_i32 = arith.constant 0 : i32
    %c0_i32_0 = arith.constant 0 : i32
    %c0_i32_1 = arith.constant 0 : i32
    return %c0_i32, %c0_i32_0 : i32, i32
  }
  func.func @transform_1(%arg0: i32, %arg1: i32) -> (i32, i32, i32) {
    %c0_i32 = arith.constant 0 : i32
    %c0_i32_0 = arith.constant 0 : i32
    return %arg0, %c0_i32, %arg1 : i32, i32, i32
  }
  func.func @transform_2(%arg0: i32, %arg1: i32) -> (i32, i32) {
    %c0_i32 = arith.constant 0 : i32
    %c0_i32_0 = arith.constant 0 : i32
    %c0_i32_1 = arith.constant 0 : i32
    return %c0_i32, %c0_i32_0 : i32, i32
  }
  func.func @transform_3(%arg0: i32, %arg1: i32) -> (i32, i32, i32) {
    %c0_i32 = arith.constant 0 : i32
    %c0_i32_0 = arith.constant 0 : i32
    return %arg0, %c0_i32, %arg1 : i32, i32, i32
  }
}

</mosaic_0001>

<bundles_post_ra>
// kernel: encoder_block_forward.1
= control target key start
LH: loop header
LB: loop body
LE: loop exit
PB: predicated region body
PF: predicated region fallthrough
CT: control target
= control target key end

     0   :  { %s462_s12 = smov 0   ;;  %s464_s13 = smov 0   ;;  %s501_s0 = inlined_call_operand.vmem [shape: bf16[8,36], index: 0, kind: input, shape index: {}]   ;;  %s502_s1 = inlined_call_operand.vmem [shape: bf16[2,36,64], index: 1, kind: input, shape index: {}]   ;;  %s503_s2 = inlined_call_operand.vmem [shape: f32[8,1], index: 2, kind: input, shape index: {}]   ;;  %s504_s3 = inlined_call_operand.vmem [shape: f32[2,8,64], index: 3, kind: output, shape index: {}]  }
   0x1   :  { %s466_s14 = smov 0  }
   0x2 LB: > { %s25_s15 = sadd.s32 1, %s433_s13  ;;  %p360_p0 = scmp.ge.s32.totalorder %s437_s14, 1  ;;  %s437_s14 = sphi %s466_s14, %s13_s14   ;;  %s433_s13 = sphi %s464_s13, %s506_s13   ;;  %s429_s12 = sphi %s462_s12, %s505_s12  }
   0x3   : > { %p27_p1 = scmp.ge.s32.totalorder %s25_s15, 2  ;;  %p156_p2 = scmp.lt.s32.totalorder %s437_s14, 3 }
   0x5   : > { %s508_s15 = smov (%p27_p1, %s25_s15), 0  ;;  %p157_p3 = pnand %p360_p0, %p156_p2 }
   0x6   : > { %p185_p4 = scmp.lt.s32.totalorder (!%p157_p3), %s429_s12, 1 }
   0x7   : > { %160 = sbr.rel (%p157_p3) target bundleno = 228 (0xe4), region = 32 }
   0xc   : > { %v439_v0 = vmov 0.0   ;;  %vm440_vm0 = vmmov 0   ;;  %v207_v1 = vld [vmem:[%s503_s2] sm:$0xff]  ;;  %s510_s12 = smov (!%p185_p4, %s429_s12), 1  ;;  %v441_v2 = vmov 0   ;;  %vm232_vm1 = vcmask 1041408  }
   0xd   : > { %373 = vmatprep.subr.bf16.mxu0 %v439_v0  ;;  %379 = vmatprep.mubr.msk.bf16.mxu0 %vm440_vm0, %v439_v0  ;;  %s383_s18 = smul.u32 20, %s510_s12  ;;  %v201_v7 = vld [vmem:[%s501_s0] sm:$0xf]  ;;  %vm228_vm2 = vcmask 293888   ;;  %s362_s24 = sshll.u32 %s510_s12, 3  ;;  %vm277_vm3 = vcmask 523264  }
   0xe   : > { %411 = vset.pattern.permute.xlu0 %v441_v2  ;;  %s199_s27 = scalar_lea.vmem %s504_s3, %s362_s24 }
   0xf   : > { %210 = vperm.xlu0 %411, %v207_v1   ;;  %s192_s21 = scalar_lea.vmem %s502_s1, %s383_s18 }
  0x10   : > { %v412_v3 = vld [vmem:[%s192_s21 + $0x10] ss:$0 sps:$4 sm:$0x33]   ;;  %v413_v5 = vld [vmem:[%s192_s21 + $0x8] sm:$0xff]   ;;  %v414_v6 = vld [vmem:[%s192_s21] sm:$0xff]  }
  0x11   : > { %v234_v4 = vsel %vm232_vm1, %v412_v3, 0 }
  0x12   : > { %374 = vmatpush3.bf16.msra.mxu0 %v234_v4 }
  0x13   : > { %375 = vmatprep.subr.bf16.mxu0 %v439_v0 }
  0x16   : > { %376 = vmatpush3.bf16.msra.mxu0 %v413_v5 }
  0x17   : > { %377 = vmatprep.subr.bf16.mxu0 %v439_v0 }
  0x1a   : > { %378 = vmatpush3.bf16.msra.mxu0 %v414_v6 }
  0x1d   : > { %380 = vmatmul.mubr.msk.bf16.vlgmr.msra.gmra.mxu0 %vm228_vm2, %v201_v7 }
  0x8a   : > { %v211_v8 = vpop.permute.xlu0 %210 }
  0xdd   : > { %v270_v9 = vpop.f32.mrf.mxu0 }
  0xde   : > { %v271_v10 = vadd.f32 %v270_v9, %v211_v8 }
  0xdf   : > { %v381_v11 = vpop.f32.mrf.mxu0 }
  0xe0   : > { %v276_v12 = vmax.f32 %v271_v10, 0.0 }
  0xe1   : > { %v273_v13 = vpop.f32.mrf.mxu0 }
  0xe2   : > { %278 = vst.msk [vmem:[%s199_s27] sm:$0xff] %vm277_vm3, %v276_v12 }
  0xe3   : > { %v382_v14 = vpop.f32.mrf.mxu0 }
  0xe4 PF: > { %s13_s14 = sadd.s32 1, %s437_s14   ;;  %s505_s12 = smov %s433_s13 }
  0xe5   : > { %p10_p5 = scmp.ge.s32.totalorder %s13_s14, 4   ;;  %s506_s13 = smov %s508_s15 }
  0xe7   :  { %12 = sbr.rel (!%p10_p5) target bundleno = 2 (0x2), region = 62 }

</bundles_post_ra>
